<compile_context>
chip_gen: v7x
topology: tpu7x:2x2x1
jax: 0.10.0
libtpu: 0.0.40
codegen_flags: <defaults>
</compile_context>

<pallas_src>
import jax
import jax.numpy as jnp
from jax.experimental import pallas as pl
from jax.experimental.pallas import tpu as pltpu


def _hbm_copy_kernel(src_hbm_ref, dst_hbm_ref, sem):
    # Direct HBM -> HBM DMA; no VMEM staging, no compute units touched.
    cp = pltpu.make_async_copy(src_hbm_ref, dst_hbm_ref, sem)
    cp.start()
    cp.wait()


def _materialize_response(response):
    """Copy `response` into a fresh HBM buffer via a single HBM->HBM DMA."""
    nbytes = response.size * jnp.dtype(response.dtype).itemsize
    return pl.pallas_call(
        _hbm_copy_kernel,
        out_shape=jax.ShapeDtypeStruct(response.shape, response.dtype),
        in_specs=[pl.BlockSpec(memory_space=pl.ANY)],
        out_specs=pl.BlockSpec(memory_space=pl.ANY),
        scratch_shapes=[pltpu.SemaphoreType.DMA(())],
        # Pure memory-bound op: read once + write once.
        cost_estimate=pl.CostEstimate(
            flops=0, transcendentals=0, bytes_accessed=2 * nbytes),
    )(response)


def encoder_return_resp_sm_forward(response, selected_classifier,
                                   materialize=False):
    """Pallas/JAX version of encoder_return_resp_sm.forward.

    Args:
      response:            (B, C) float array (softmaxed classifier responses).
      selected_classifier: (B, 1) int32 array.
      materialize:         if True, force a copy of `response` into a fresh
                           device buffer via a single HBM->HBM DMA kernel.

    Returns:
      dict with keys 'selected' and 'response', exactly like the PyTorch
      module's `code_dict`.
    """
    # TODO(synk): the PyTorch `config.use_gpu` branch only controls device
    # placement; on TPU both branches are the same pass-through, so the
    # fastest correct implementation launches no kernel at all.
    if materialize:
        response = _materialize_response(response)

    return {
        'selected': selected_classifier,   # never routed through a kernel
        'response': response,
    }


if __name__ == "__main__":
    key = jax.random.PRNGKey(0)
    k_resp, k_sel = jax.random.split(key)

    batch = 2
    num_classifiers = 8  # len(config.cifar_classifier_indexes)

    # "resp_sm" = softmaxed response over classifiers.
    logits = jax.random.normal(k_resp, (batch, num_classifiers), jnp.float32)
    response = jax.nn.softmax(logits, axis=-1)

    selected_classifier = jax.random.randint(
        k_sel, (batch, 1), 0, num_classifiers, dtype=jnp.int32)

    # Default (recommended) path: no kernel, pure pass-through.
    out_fast = encoder_return_resp_sm_forward(response, selected_classifier)
    jax.block_until_ready(out_fast)

    # Exercise the HBM->HBM DMA materializing copy once as well.
    out_kernel = encoder_return_resp_sm_forward(
        response, selected_classifier, materialize=True)
    jax.block_until_ready(out_kernel)

    # Sanity checks: exact pass-through semantics on both paths.
    assert out_fast['response'].shape == (batch, num_classifiers)
    assert out_fast['selected'].shape == (batch, 1)
    assert jnp.array_equal(out_fast['response'], response)
    assert jnp.array_equal(out_fast['selected'], selected_classifier)
    assert jnp.array_equal(out_kernel['response'], response)
    assert jnp.array_equal(out_kernel['selected'], selected_classifier)

    print("KERNEL_OK")
</pallas_src>

<mosaic_0001>
module attributes {stable_mosaic.version = 11 : i64} {
  func.func @_hbm_copy_kernel(%arg0: memref<2x8xf32, #tpu.memory_space<any>>, %arg1: memref<2x8xf32, #tpu.memory_space<any>>, %arg2: memref<!tpu.dma_semaphore, #tpu.memory_space<semaphore_mem>>) attributes {dimension_semantics = [], scalar_prefetch = 0 : i64, scratch_operands = 1 : i64, tpu.core_type = #tpu.core_type<tc>} {
    tpu.enqueue_dma source(%arg0 : memref<2x8xf32, #tpu.memory_space<any>>) target(%arg1 : memref<2x8xf32, #tpu.memory_space<any>>) target_semaphore(%arg2 : memref<!tpu.dma_semaphore, #tpu.memory_space<semaphore_mem>>)
    tpu.wait_dma2 semaphore(%arg2 : memref<!tpu.dma_semaphore, #tpu.memory_space<semaphore_mem>>) src(%arg0 : memref<2x8xf32, #tpu.memory_space<any>>) dst(%arg1 : memref<2x8xf32, #tpu.memory_space<any>>)
    return
  }
}

</mosaic_0001>

<bundles_post_ra>
// kernel: tpu_custom_call.1
= control target key start
LH: loop header
LB: loop body
LE: loop exit
PB: predicated region body
PF: predicated region fallthrough
CT: control target
= control target key end

     0   :  { %s34_s6 = smov [#allocation2]   ;;  %s35_s7 = smov [#allocation3]   ;;  %s53_s0 = inlined_call_operand.hbm [shape: f32[2,8], index: 0, kind: input, shape index: {}]   ;;  %s54_s1 = inlined_call_operand.hbm [shape: f32[2,8], index: 1, kind: output, shape index: {}]  }
   0x1   :  { %s36_s8 = smov 0  }
   0x2   :  { %18 = dma.general %s53_s0, 32, %s54_s1, %s34_s6, %s35_s7, [#allocation4], %s36_s8, 0  }
   0x3   :  { %32 = dma.done.wait [#allocation2], 32 }
   0x4   :  { %33 = vsyncadd [#allocation2], 4294967264 }
   0x5   :  { %22 = vsyncmov [#allocation2] }
   0x8   :  { %s23_s13 = vpop.sfrf %22 }
   0x9   :  { %p28_p0 = scmp.ne.s32.totalorder %s23_s13, 0 }
   0xb   :  { %27 = shalt.err (%p28_p0)  }

</bundles_post_ra>
